<compile_context>
chip_gen: v6e
topology: v6e:2x2x1
jax: 0.10.0
libtpu: 0.0.40
codegen_flags: <defaults>
</compile_context>

<pallas_src>
import numpy as np

import jax
import jax.numpy as jnp
from jax.experimental import pallas as pl
from jax.experimental.pallas import tpu as pltpu


_LANE_CANDIDATES = (1024, 512, 256, 128)  # all multiples of 128 -> unmasked vst


def _is_pallas_dtype(dt) -> bool:
    return dt == jnp.float32 or dt == jnp.bfloat16


def _scalar_mul_kernel(w_ref, x_ref, o_ref):
    # w_ref: (1,) weight in SMEM; x_ref / o_ref: (tm, lanes) VMEM tiles.
    w = w_ref[0].astype(o_ref.dtype)
    o_ref[...] = x_ref[...].astype(o_ref.dtype) * w


def _device_tuning():
    """Per-generation (block_bytes, vmem_limit_bytes, two_tensorcores)."""
    block_bytes = 2 << 20   # 2 MiB: safe default (fits v5e's small scoped VMEM)
    vmem_limit = 32 << 20
    two_cores = False
    try:
        kind = jax.devices()[0].device_kind.lower()
    except Exception:
        kind = ""
    if "v7" in kind or "7x" in kind:
        # v7x: ~3.2 TB/s HBM per TC -> bigger blocks amortize per-step cost.
        # Physical VMEM is only 64 MiB, so cap the scoped limit with headroom.
        block_bytes = 4 << 20
        vmem_limit = 48 << 20
        two_cores = True
    elif "v6" in kind:
        # v6e: 128 MiB physical VMEM, ~1.4 TB/s HBM.
        block_bytes = 4 << 20
        vmem_limit = 48 << 20
    return block_bytes, vmem_limit, two_cores


def fixed_scalar_layer(x: jax.Array, weight, *,
                       min_pallas_bytes: int = 256 * 1024,
                       block_bytes: int | None = None) -> jax.Array:
    """Equivalent of FixedScalarLayer(weight)(x): elementwise weight * x."""
    orig_shape = x.shape
    out_dtype = jnp.result_type(x, weight)      # matches `weight * x` promotion
    n = int(x.size)
    in_dtype = np.dtype(x.dtype)
    itemsize = in_dtype.itemsize
    out_itemsize = np.dtype(out_dtype).itemsize

    dev_block_bytes, vmem_limit, two_cores = _device_tuning()
    if block_bytes is None:
        block_bytes = dev_block_bytes

    # ---- cheap fallbacks: plain XLA multiply --------------------------------
    #  * tiny tensors: custom-call launch + plumbing dominates; XLA fuses the
    #    scalar multiply into neighbouring ops for free.
    #  * dtypes outside {f32, bf16} (ints etc. get correct promotion from jnp).
    #  * sizes not divisible by 128: a lane remainder would need a host-side
    #    pad + slice (extra full HBM round trips) -- never worth it here.
    use_pallas = (
        n > 0
        and _is_pallas_dtype(in_dtype)
        and _is_pallas_dtype(np.dtype(out_dtype))
        and n * itemsize >= min_pallas_bytes
    )
    lanes = 0
    if use_pallas:
        for cand in _LANE_CANDIDATES:
            if n % cand == 0:
                lanes = cand
                break
        use_pallas = lanes > 0
    if not use_pallas:
        return weight * x

    rows = n // lanes

    # ---- block sizing: keep block BYTES ~block_bytes regardless of dtype ----
    wide = max(itemsize, out_itemsize)
    sublane = max(8, 32 // min(itemsize, out_itemsize))   # f32: 8, bf16: 16
    tm = max(sublane, (block_bytes // (lanes * wide)) // sublane * sublane)

    if tm >= rows:
        # Whole (small) array as one full block; "block == full array dims"
        # lifts the sublane-multiple requirement.
        tm = rows
    elif two_cores:
        # v7x shards the "parallel" grid axis across 2 TensorCores: prefer an
        # even grid with >= 4 steps (balanced TCs + per-core double buffering).
        g = pl.cdiv(rows, tm)
        while (g < 4 or g % 2 != 0) and tm // 2 >= sublane and (tm // 2) % sublane == 0:
            tm //= 2
            g = pl.cdiv(rows, tm)

    grid = (pl.cdiv(rows, tm),)

    # Free contiguous reshape to a lane-dense slab: NO jnp.pad / slice.  The
    # (possibly partial) last grid block is handled by masked OOB writes.
    x2d = x.reshape(rows, lanes)
    w_arr = jnp.asarray(weight, dtype=jnp.float32).reshape(1)

    out2d = pl.pallas_call(
        _scalar_mul_kernel,
        out_shape=jax.ShapeDtypeStruct((rows, lanes), out_dtype),
        grid=grid,
        in_specs=[
            pl.BlockSpec(memory_space=pltpu.MemorySpace.SMEM),  # weight scalar
            pl.BlockSpec((tm, lanes), lambda i: (i, 0)),        # input tile
        ],
        out_specs=pl.BlockSpec((tm, lanes), lambda i: (i, 0)),
        compiler_params=pltpu.CompilerParams(
            dimension_semantics=("parallel",),
            vmem_limit_bytes=vmem_limit,
        ),
        cost_estimate=pl.CostEstimate(
            flops=n,
            transcendentals=0,
            bytes_accessed=n * (itemsize + out_itemsize),
        ),
        # TODO(synk): add input_output_aliases={1: 0} when callers donate x
        # (halves peak HBM footprint; only valid with donation + same dtype).
    )(w_arr, x2d)

    return out2d.reshape(orig_shape)


class FixedScalarLayer:
    """JAX/Pallas analogue of the PyTorch module: out = weight * input."""

    def __init__(self, value) -> None:
        self.weight = value

    def __call__(self, x: jax.Array) -> jax.Array:
        return fixed_scalar_layer(x, self.weight)


if __name__ == "__main__":
    key = jax.random.PRNGKey(0)
    k1, k2, k3 = jax.random.split(key, 3)
    weight = 2.5
    layer = FixedScalarLayer(weight)

    # (1) Module-sized input through the Pallas path (min_pallas_bytes=0 forces
    #     the kernel; the default wrapper would short-circuit this tiny tensor).
    x = jax.random.normal(k1, (2, 4, 16, 16), dtype=jnp.float32)
    out = jax.block_until_ready(fixed_scalar_layer(x, weight, min_pallas_bytes=0))
    ref = weight * x
    assert out.shape == ref.shape and out.dtype == ref.dtype
    assert jnp.allclose(out, ref, atol=1e-6, rtol=1e-6)

    # (2) Default path: tiny tensor short-circuits to a plain XLA multiply.
    out_sc = jax.block_until_ready(layer(x))
    assert jnp.allclose(out_sc, ref, atol=1e-6, rtol=1e-6)

    # (3) Multi-step grid with a partial (masked) last block: rows=20, tm=8.
    x3 = jax.random.normal(k2, (2, 5, 8, 256), dtype=jnp.float32)
    out3 = jax.block_until_ready(
        fixed_scalar_layer(x3, weight, min_pallas_bytes=0, block_bytes=16 * 1024))
    ref3 = weight * x3
    assert jnp.allclose(out3, ref3, atol=1e-6, rtol=1e-6)

    # (4) bf16 through the Pallas path (dtype-scaled tile, bf16-native multiply).
    x4 = jax.random.normal(k3, (2, 8, 16, 64), dtype=jnp.bfloat16)
    out4 = jax.block_until_ready(fixed_scalar_layer(x4, weight, min_pallas_bytes=0))
    ref4 = weight * x4
    assert out4.dtype == ref4.dtype
    assert jnp.allclose(out4.astype(jnp.float32), ref4.astype(jnp.float32),
                        atol=1e-2, rtol=1e-2)

    # (5) Non-128-divisible shape falls back to plain XLA (never jnp.pad).
    x5 = jax.random.normal(k1, (3, 5, 7), dtype=jnp.float32)
    assert jnp.allclose(fixed_scalar_layer(x5, weight), weight * x5)

    print("KERNEL_OK")
</pallas_src>

<mosaic_0001>
module attributes {stable_mosaic.version = 11 : i64} {
  func.func @_scalar_mul_kernel(%arg0: i32, %arg1: memref<1xf32, #tpu.memory_space<smem>>, %arg2: memref<2x1024xf32, #tpu.memory_space<vmem>>, %arg3: memref<2x1024xf32, #tpu.memory_space<vmem>>) attributes {dimension_semantics = [#tpu.dimension_semantics<parallel>], iteration_bounds = array<i64: 1>, scalar_prefetch = 0 : i64, scratch_operands = 0 : i64, tpu.core_type = #tpu.core_type<tc>, window_params = [{transform_indices = @transform_0, window_bounds = array<i64: 1>}, {transform_indices = @transform_1, window_bounds = array<i64: 2, 1024>}, {transform_indices = @transform_2, window_bounds = array<i64: 2, 1024>}]} {
    %c0 = arith.constant 0 : index
    %0 = memref.load %arg1[%c0] : memref<1xf32, #tpu.memory_space<smem>>
    %c0_0 = arith.constant 0 : index
    %c0_1 = arith.constant 0 : index
    %1 = vector.load %arg2[%c0_0, %c0_1] : memref<2x1024xf32, #tpu.memory_space<vmem>>, vector<2x1024xf32>
    %2 = vector.broadcast %0 : f32 to vector<2x1024xf32>
    %3 = arith.mulf %1, %2 : vector<2x1024xf32>
    %c0_2 = arith.constant 0 : index
    %c0_3 = arith.constant 0 : index
    %4 = vector.load %arg3[%c0_2, %c0_3] : memref<2x1024xf32, #tpu.memory_space<vmem>>, vector<2x1024xf32>
    tpu.vector_store %arg3[%c0_2, %c0_3], %3 {strides = array<i32>} : memref<2x1024xf32, #tpu.memory_space<vmem>>, vector<2x1024xf32>,
    return
  }
  func.func @transform_0(%arg0: i32) -> i32 {
    %c0_i32 = arith.constant 0 : i32
    %c0_i32_0 = arith.constant 0 : i32
    return %c0_i32 : i32
  }
  func.func @transform_1(%arg0: i32) -> (i32, i32) {
    %c0_i32 = arith.constant 0 : i32
    %c0_i32_0 = arith.constant 0 : i32
    return %arg0, %c0_i32 : i32, i32
  }
  func.func @transform_2(%arg0: i32) -> (i32, i32) {
    %c0_i32 = arith.constant 0 : i32
    %c0_i32_0 = arith.constant 0 : i32
    return %arg0, %c0_i32 : i32, i32
  }
}

</mosaic_0001>

<bundles_post_ra>
// kernel: tpu_custom_call.1
= control target key start
LH: loop header
LB: loop body
LE: loop exit
PB: predicated region body
PF: predicated region fallthrough
CT: control target
= control target key end

     0   :  { %8 = vsyncpa [#allocation4], 0  ;;  %s120_s0 = inlined_call_operand.<no memory space> [shape: f32[1], index: 0, kind: input, shape index: {}]   ;;  %s121_s1 = inlined_call_operand.hbm [shape: f32[2,1024], index: 1, kind: input, shape index: {}]   ;;  %s122_s2 = inlined_call_operand.hbm [shape: f32[2,1024], index: 2, kind: output, shape index: {}]  }
   0x1   :  { %9 = vsyncpa [#allocation5], 0  ;;  %s94_s9 = smov [#allocation3]  }
   0x2   :  { %s18_s10 = sshll.u32 %s94_s9, 4  ;;  %s19_s10 = int_to_ptr.vmem [resolvable:$true] %s18_s10 }
   0x3   :  { %s58_s11 = scalar_lea.vmem %s19_s10, 256  ;;  %p63_p1 = scmp.lt.s32.totalorder %s19_s10, %s19_s10 }
   0x4   :  { %p59_p0 = scmp.ne.s32.totalorder %s19_s10, %s58_s11  ;;  %p64_p2 = scmp.lt.s32.totalorder %s58_s11, %s58_s11 }
   0x6   :  { %p65_p3 = por %p64_p2, %p63_p1 }
   0x8   :  { %p66_p4 = pnand %p65_p3, %p59_p0 }
   0xa   :  { %69 = shalt.err (!%p66_p4)
}
   0xb   :  { %21 = dma.hbm_to_vmem [thread:$0]  %s121_s1, 256, %s19_s10, [#allocation4]  }
   0xc   :  { %90 = dma.done.wait [#allocation4], 256  }
   0xd   :  { %91 = vsyncadd [#allocation4], 4294967040  ;;  %v28_v0 = vstv %s120_s0  ;;  %s95_s16 = smov [#allocation6]   ;;  %v26_v1 = vld [vmem:[#allocation3] sm:$0xff]  ;;  %v27_v2 = vld [vmem:[#allocation3 + $0x8] sm:$0xff] }
   0xe   :  { %s39_s17 = sshll.u32 %s95_s16, 4  ;;  %v29_v3 = vmul.f32 %v28_v0, %v26_v1  ;;  %v30_v4 = vmul.f32 %v28_v0, %v27_v2  ;;  %s40_s17 = int_to_ptr.vmem [resolvable:$true] %s39_s17 }
   0xf   :  { %s70_s18 = scalar_lea.vmem %s40_s17, 256  ;;  %p75_p6 = scmp.lt.s32.totalorder %s40_s17, %s40_s17 }
  0x10   :  { %31 = vst [vmem:[#allocation6] sm:$0xff] %v29_v3  ;;  %32 = vst [vmem:[#allocation6 + $0x8] sm:$0xff] %v30_v4  ;;  %p71_p5 = scmp.ne.s32.totalorder %s40_s17, %s70_s18  ;;  %p76_p7 = scmp.lt.s32.totalorder %s70_s18, %s70_s18 }
  0x12   :  { %p77_p8 = por %p76_p7, %p75_p6 }
  0x14   :  { %p78_p9 = pnand %p77_p8, %p71_p5 }
  0x16   :  { %81 = shalt.err (!%p78_p9)
}
  0x17   :  { %42 = dma.vmem_to_hbm [thread:$0]  %s40_s17, 256, %s122_s2, [#allocation5]  }
  0x18   :  { %92 = dma.done.wait [#allocation5], 256  }
  0x19   :  { %93 = vsyncadd [#allocation5], 4294967040 }
  0x1a   :  { %46 = vsyncpa [#allocation4], 1 }
  0x1b   :  { %47 = vsyncpa [#allocation5], 1 }

</bundles_post_ra>
